<compile_context>
chip_gen: v7x
topology: tpu7x:2x2x1
jax: 0.10.0
libtpu: 0.0.40
codegen_flags: <defaults>
</compile_context>

<pallas_src>
import functools
import math

import jax
import jax.numpy as jnp
from jax import lax
from jax.experimental import pallas as pl
from jax.experimental.pallas import tpu as pltpu

# ---------------------------------------------------------------------------
# Model hyperparameters (small, deterministic synthetic config)
# ---------------------------------------------------------------------------
D_MODEL = 32
NUM_HEADS = 4
HEAD_DIM = D_MODEL // NUM_HEADS
BATCH = 2
SEQ_LEN = 8


def _mhsa_kernel(x_ref, wqkv_ref, wo_ref, o_ref, *, num_heads):
    """Single grid step over the whole problem.

    x_ref    : (B, S, D)   input
    wqkv_ref : (D, 3*D)    fused, pre-transposed QKV weight (Q cols pre-scaled)
    wo_ref   : (D, D)      pre-transposed output-projection weight
    o_ref    : (B, S, D)   output
    """
    B, S, D = x_ref.shape
    hd = D // num_heads
    rows = B * S

    # Fused QKV projection over all rows — one MXU push, result stays in vregs.
    x2 = x_ref[...].reshape(rows, D)
    qkv = jnp.dot(x2, wqkv_ref[...], preferred_element_type=jnp.float32)  # (rows, 3D)
    qkv = qkv.reshape(B, S, 3 * D)

    # Additive causal mask, computed once and reused for every head.
    row_i = lax.broadcasted_iota(jnp.int32, (S, S), 0)
    col_i = lax.broadcasted_iota(jnp.int32, (S, S), 1)
    add_mask = jnp.where(col_i <= row_i, 0.0, -1e30).astype(jnp.float32)  # (S, S)

    head_outs = []
    for h in range(num_heads):  # static unroll over heads; batched over B inside
        q_lo = h * hd
        k_lo = D + h * hd
        v_lo = 2 * D + h * hd
        qh = qkv[:, :, q_lo:q_lo + hd]   # (B, S, hd), 1/sqrt(hd) pre-folded into Wq
        kh = qkv[:, :, k_lo:k_lo + hd]   # (B, S, hd)
        vh = qkv[:, :, v_lo:v_lo + hd]   # (B, S, hd)

        # scores = q_h @ k_h^T, batched over B.
        s = jnp.einsum("bqd,bkd->bqk", qh, kh,
                       preferred_element_type=jnp.float32)      # (B, S, S)
        s = s + add_mask[None]

        # Numerically-stable softmax in f32 (exact reciprocal — 1e-4 tolerance).
        m = jnp.max(s, axis=-1, keepdims=True)
        p = jnp.exp(s - m)
        denom = jnp.sum(p, axis=-1, keepdims=True)
        p = p * (1.0 / denom)

        head_outs.append(
            jnp.einsum("bqk,bkd->bqd", p, vh,
                       preferred_element_type=jnp.float32))     # (B, S, hd)

    # One lane-concatenate (XLU) + one lane-dense store path into the Wo matmul.
    attn = jnp.concatenate(head_outs, axis=-1).reshape(rows, D)  # (rows, D)
    out = jnp.dot(attn, wo_ref[...], preferred_element_type=jnp.float32)
    o_ref[...] = out.reshape(B, S, D).astype(o_ref.dtype)


def multi_head_self_attention(x, wq, wk, wv, wo, num_heads=NUM_HEADS):
    """x: (B, S, D) float32;  w*: (D, D) in the PyTorch Linear (out, in) layout."""
    B, S, D = x.shape
    hd = D // num_heads
    scale = 1.0 / math.sqrt(hd)

    # Fuse + pre-transpose projection weights at trace time (free):
    # columns laid out as [Q | K | V], with 1/sqrt(hd) folded into the Q columns.
    wqkv_t = jnp.concatenate([(wq * scale).T, wk.T, wv.T], axis=1)  # (D, 3D)
    wo_t = wo.T                                                     # (D, D)

    kernel = functools.partial(_mhsa_kernel, num_heads=num_heads)
    return pl.pallas_call(
        kernel,
        out_shape=jax.ShapeDtypeStruct((B, S, D), x.dtype),
        grid_spec=pl.GridSpec(
            grid=(1,),
            in_specs=[
                pl.BlockSpec((B, S, D), lambda i: (0, 0, 0)),     # x
                pl.BlockSpec((D, 3 * D), lambda i: (0, 0)),       # fused Wqkv^T (resident)
                pl.BlockSpec((D, D), lambda i: (0, 0)),           # Wo^T (resident)
            ],
            out_specs=pl.BlockSpec((B, S, D), lambda i: (0, 0, 0)),
        ),
        compiler_params=pltpu.CompilerParams(
            dimension_semantics=("arbitrary",)),
    )(x, wqkv_t, wo_t)


def _reference(x, wq, wk, wv, wo):
    """Pure-JAX reference mirroring the PyTorch forward."""
    B, S, D = x.shape
    q = x @ wq.T
    k = x @ wk.T
    v = x @ wv.T
    q = q.reshape(B, S, NUM_HEADS, HEAD_DIM).transpose(0, 2, 1, 3)
    k = k.reshape(B, S, NUM_HEADS, HEAD_DIM).transpose(0, 2, 1, 3)
    v = v.reshape(B, S, NUM_HEADS, HEAD_DIM).transpose(0, 2, 1, 3)
    scores = jnp.einsum("bhqd,bhkd->bhqk", q, k) / math.sqrt(HEAD_DIM)
    mask = jnp.tril(jnp.ones((S, S), dtype=bool))
    scores = jnp.where(mask[None, None], scores, -1e30)
    p = jax.nn.softmax(scores, axis=-1)
    attn = jnp.einsum("bhqk,bhkd->bhqd", p, v)
    attn = attn.transpose(0, 2, 1, 3).reshape(B, S, D)
    return attn @ wo.T


if __name__ == "__main__":
    key = jax.random.PRNGKey(0)
    kx, kq, kk, kv, ko = jax.random.split(key, 5)

    # Deterministic synthetic parameters (Linear: weight shape (out, in), no bias)
    std = 1.0 / math.sqrt(D_MODEL)
    x = jax.random.normal(kx, (BATCH, SEQ_LEN, D_MODEL), dtype=jnp.float32)
    wq = jax.random.normal(kq, (D_MODEL, D_MODEL), dtype=jnp.float32) * std
    wk = jax.random.normal(kk, (D_MODEL, D_MODEL), dtype=jnp.float32) * std
    wv = jax.random.normal(kv, (D_MODEL, D_MODEL), dtype=jnp.float32) * std
    wo = jax.random.normal(ko, (D_MODEL, D_MODEL), dtype=jnp.float32) * std

    out = multi_head_self_attention(x, wq, wk, wv, wo)
    out = jax.block_until_ready(out)

    ref = _reference(x, wq, wk, wv, wo)
    assert out.shape == (BATCH, SEQ_LEN, D_MODEL)
    assert jnp.allclose(out, ref, atol=1e-4, rtol=1e-4), "mismatch vs reference"

    print("KERNEL_OK")
</pallas_src>

<mosaic_0001>
module attributes {stable_mosaic.version = 11 : i64} {
  func.func @_mhsa_kernel(%arg0: i32, %arg1: memref<2x8x32xf32, #tpu.memory_space<vmem>>, %arg2: memref<32x96xf32, #tpu.memory_space<vmem>>, %arg3: memref<32x32xf32, #tpu.memory_space<vmem>>, %arg4: memref<2x8x32xf32, #tpu.memory_space<vmem>>) attributes {dimension_semantics = [#tpu.dimension_semantics<arbitrary>], iteration_bounds = array<i64: 1>, scalar_prefetch = 0 : i64, scratch_operands = 0 : i64, tpu.core_type = #tpu.core_type<tc>, window_params = [{pipeline_mode = #tpu.pipeline_mode<synchronous>, transform_indices = @transform_0, window_bounds = array<i64: 2, 8, 32>}, {pipeline_mode = #tpu.pipeline_mode<synchronous>, transform_indices = @transform_1, window_bounds = array<i64: 32, 96>}, {pipeline_mode = #tpu.pipeline_mode<synchronous>, transform_indices = @transform_2, window_bounds = array<i64: 32, 32>}, {pipeline_mode = #tpu.pipeline_mode<synchronous>, transform_indices = @transform_3, window_bounds = array<i64: 2, 8, 32>}]} {
    %c0 = arith.constant 0 : index
    %c0_0 = arith.constant 0 : index
    %c0_1 = arith.constant 0 : index
    %0 = vector.load %arg1[%c0, %c0_0, %c0_1] : memref<2x8x32xf32, #tpu.memory_space<vmem>>, vector<2x8x32xf32>
    %1 = vector.shape_cast %0 : vector<2x8x32xf32> to vector<16x32xf32>
    %c0_2 = arith.constant 0 : index
    %c0_3 = arith.constant 0 : index
    %2 = vector.load %arg2[%c0_2, %c0_3] : memref<32x96xf32, #tpu.memory_space<vmem>>, vector<32x96xf32>
    %cst = arith.constant dense<0.000000e+00> : vector<16x96xf32>
    %3 = tpu.matmul %1, %2, %cst {dimension_numbers = #tpu.dot_dimension_numbers<[1], [0], [0], [1], [0, 0, 1, 1], [], []>} : vector<16x32xf32>, vector<32x96xf32>, vector<16x96xf32> -> vector<16x96xf32>
    %4 = vector.shape_cast %3 : vector<16x96xf32> to vector<2x8x96xf32>
    %5 = tpu.iota {dimensions = array<i32: 0>} : vector<8x8xi32>
    %6 = tpu.iota {dimensions = array<i32: 1>} : vector<8x8xi32>
    %7 = arith.cmpi sle, %6, %5 : vector<8x8xi32>
    %cst_4 = arith.constant 0.000000e+00 : f32
    %cst_5 = arith.constant -1.000000e+30 : f32
    %8 = vector.broadcast %cst_4 : f32 to vector<8x8xf32>
    %9 = vector.broadcast %cst_5 : f32 to vector<8x8xf32>
    %10 = arith.select %7, %8, %9 : vector<8x8xi1>, vector<8x8xf32>
    %11 = vector.extract_strided_slice %4 {offsets = [0, 0, 0], sizes = [2, 8, 8], strides = [1, 1, 1]} : vector<2x8x96xf32> to vector<2x8x8xf32>
    %12 = vector.extract_strided_slice %4 {offsets = [0, 0, 32], sizes = [2, 8, 8], strides = [1, 1, 1]} : vector<2x8x96xf32> to vector<2x8x8xf32>
    %13 = vector.extract_strided_slice %4 {offsets = [0, 0, 64], sizes = [2, 8, 8], strides = [1, 1, 1]} : vector<2x8x96xf32> to vector<2x8x8xf32>
    "tpu.trace_start"() <{level = 10 : i32, message = "bqd,bkd->bqk"}> : () -> ()
    %cst_6 = arith.constant dense<0.000000e+00> : vector<2x8x8xf32>
    %14 = tpu.matmul %11, %12, %cst_6 {dimension_numbers = #tpu.dot_dimension_numbers<[2], [2], [1], [1], [0, 0, 0, 1, 1, 1], [0], [0]>} : vector<2x8x8xf32>, vector<2x8x8xf32>, vector<2x8x8xf32> -> vector<2x8x8xf32>
    "tpu.trace_stop"() : () -> ()
    %15 = vector.shape_cast %10 : vector<8x8xf32> to vector<1x8x8xf32>
    %16 = vector.broadcast %15 : vector<1x8x8xf32> to vector<2x8x8xf32>
    %17 = arith.addf %14, %16 : vector<2x8x8xf32>
    %cst_7 = arith.constant dense<0xFF800000> : vector<2x8xf32>
    %18 = vector.multi_reduction <maximumf>, %17, %cst_7 [2] : vector<2x8x8xf32> to vector<2x8xf32>
    %19 = vector.shape_cast %18 : vector<2x8xf32> to vector<2x8x1xf32>
    %20 = vector.broadcast %19 : vector<2x8x1xf32> to vector<2x8x8xf32>
    %21 = arith.subf %17, %20 : vector<2x8x8xf32>
    %22 = math.exp %21 : vector<2x8x8xf32>
    %cst_8 = arith.constant dense<0.000000e+00> : vector<2x8xf32>
    %23 = vector.multi_reduction <add>, %22, %cst_8 [2] : vector<2x8x8xf32> to vector<2x8xf32>
    %24 = vector.shape_cast %23 : vector<2x8xf32> to vector<2x8x1xf32>
    %cst_9 = arith.constant 1.000000e+00 : f32
    %25 = vector.broadcast %cst_9 : f32 to vector<2x8x1xf32>
    %26 = arith.divf %25, %24 : vector<2x8x1xf32>
    %27 = vector.broadcast %26 : vector<2x8x1xf32> to vector<2x8x8xf32>
    %28 = arith.mulf %22, %27 : vector<2x8x8xf32>
    "tpu.trace_start"() <{level = 10 : i32, message = "bqk,bkd->bqd"}> : () -> ()
    %cst_10 = arith.constant dense<0.000000e+00> : vector<2x8x8xf32>
    %29 = tpu.matmul %28, %13, %cst_10 {dimension_numbers = #tpu.dot_dimension_numbers<[2], [1], [1], [2], [0, 0, 0, 1, 1, 2], [0], [0]>} : vector<2x8x8xf32>, vector<2x8x8xf32>, vector<2x8x8xf32> -> vector<2x8x8xf32>
    "tpu.trace_stop"() : () -> ()
    %30 = vector.extract_strided_slice %4 {offsets = [0, 0, 8], sizes = [2, 8, 8], strides = [1, 1, 1]} : vector<2x8x96xf32> to vector<2x8x8xf32>
    %31 = vector.extract_strided_slice %4 {offsets = [0, 0, 40], sizes = [2, 8, 8], strides = [1, 1, 1]} : vector<2x8x96xf32> to vector<2x8x8xf32>
    %32 = vector.extract_strided_slice %4 {offsets = [0, 0, 72], sizes = [2, 8, 8], strides = [1, 1, 1]} : vector<2x8x96xf32> to vector<2x8x8xf32>
    "tpu.trace_start"() <{level = 10 : i32, message = "bqd,bkd->bqk"}> : () -> ()
    %cst_11 = arith.constant dense<0.000000e+00> : vector<2x8x8xf32>
    %33 = tpu.matmul %30, %31, %cst_11 {dimension_numbers = #tpu.dot_dimension_numbers<[2], [2], [1], [1], [0, 0, 0, 1, 1, 1], [0], [0]>} : vector<2x8x8xf32>, vector<2x8x8xf32>, vector<2x8x8xf32> -> vector<2x8x8xf32>
    "tpu.trace_stop"() : () -> ()
    %34 = vector.shape_cast %10 : vector<8x8xf32> to vector<1x8x8xf32>
    %35 = vector.broadcast %34 : vector<1x8x8xf32> to vector<2x8x8xf32>
    %36 = arith.addf %33, %35 : vector<2x8x8xf32>
    %cst_12 = arith.constant dense<0xFF800000> : vector<2x8xf32>
    %37 = vector.multi_reduction <maximumf>, %36, %cst_12 [2] : vector<2x8x8xf32> to vector<2x8xf32>
    %38 = vector.shape_cast %37 : vector<2x8xf32> to vector<2x8x1xf32>
    %39 = vector.broadcast %38 : vector<2x8x1xf32> to vector<2x8x8xf32>
    %40 = arith.subf %36, %39 : vector<2x8x8xf32>
    %41 = math.exp %40 : vector<2x8x8xf32>
    %cst_13 = arith.constant dense<0.000000e+00> : vector<2x8xf32>
    %42 = vector.multi_reduction <add>, %41, %cst_13 [2] : vector<2x8x8xf32> to vector<2x8xf32>
    %43 = vector.shape_cast %42 : vector<2x8xf32> to vector<2x8x1xf32>
    %cst_14 = arith.constant 1.000000e+00 : f32
    %44 = vector.broadcast %cst_14 : f32 to vector<2x8x1xf32>
    %45 = arith.divf %44, %43 : vector<2x8x1xf32>
    %46 = vector.broadcast %45 : vector<2x8x1xf32> to vector<2x8x8xf32>
    %47 = arith.mulf %41, %46 : vector<2x8x8xf32>
    "tpu.trace_start"() <{level = 10 : i32, message = "bqk,bkd->bqd"}> : () -> ()
    %cst_15 = arith.constant dense<0.000000e+00> : vector<2x8x8xf32>
    %48 = tpu.matmul %47, %32, %cst_15 {dimension_numbers = #tpu.dot_dimension_numbers<[2], [1], [1], [2], [0, 0, 0, 1, 1, 2], [0], [0]>} : vector<2x8x8xf32>, vector<2x8x8xf32>, vector<2x8x8xf32> -> vector<2x8x8xf32>
    "tpu.trace_stop"() : () -> ()
    %49 = vector.extract_strided_slice %4 {offsets = [0, 0, 16], sizes = [2, 8, 8], strides = [1, 1, 1]} : vector<2x8x96xf32> to vector<2x8x8xf32>
    %50 = vector.extract_strided_slice %4 {offsets = [0, 0, 48], sizes = [2, 8, 8], strides = [1, 1, 1]} : vector<2x8x96xf32> to vector<2x8x8xf32>
    %51 = vector.extract_strided_slice %4 {offsets = [0, 0, 80], sizes = [2, 8, 8], strides = [1, 1, 1]} : vector<2x8x96xf32> to vector<2x8x8xf32>
    "tpu.trace_start"() <{level = 10 : i32, message = "bqd,bkd->bqk"}> : () -> ()
    %cst_16 = arith.constant dense<0.000000e+00> : vector<2x8x8xf32>
    %52 = tpu.matmul %49, %50, %cst_16 {dimension_numbers = #tpu.dot_dimension_numbers<[2], [2], [1], [1], [0, 0, 0, 1, 1, 1], [0], [0]>} : vector<2x8x8xf32>, vector<2x8x8xf32>, vector<2x8x8xf32> -> vector<2x8x8xf32>
    "tpu.trace_stop"() : () -> ()
    %53 = vector.shape_cast %10 : vector<8x8xf32> to vector<1x8x8xf32>
    %54 = vector.broadcast %53 : vector<1x8x8xf32> to vector<2x8x8xf32>
    %55 = arith.addf %52, %54 : vector<2x8x8xf32>
    %cst_17 = arith.constant dense<0xFF800000> : vector<2x8xf32>
    %56 = vector.multi_reduction <maximumf>, %55, %cst_17 [2] : vector<2x8x8xf32> to vector<2x8xf32>
    %57 = vector.shape_cast %56 : vector<2x8xf32> to vector<2x8x1xf32>
    %58 = vector.broadcast %57 : vector<2x8x1xf32> to vector<2x8x8xf32>
    %59 = arith.subf %55, %58 : vector<2x8x8xf32>
    %60 = math.exp %59 : vector<2x8x8xf32>
    %cst_18 = arith.constant dense<0.000000e+00> : vector<2x8xf32>
    %61 = vector.multi_reduction <add>, %60, %cst_18 [2] : vector<2x8x8xf32> to vector<2x8xf32>
    %62 = vector.shape_cast %61 : vector<2x8xf32> to vector<2x8x1xf32>
    %cst_19 = arith.constant 1.000000e+00 : f32
    %63 = vector.broadcast %cst_19 : f32 to vector<2x8x1xf32>
    %64 = arith.divf %63, %62 : vector<2x8x1xf32>
    %65 = vector.broadcast %64 : vector<2x8x1xf32> to vector<2x8x8xf32>
    %66 = arith.mulf %60, %65 : vector<2x8x8xf32>
    "tpu.trace_start"() <{level = 10 : i32, message = "bqk,bkd->bqd"}> : () -> ()
    %cst_20 = arith.constant dense<0.000000e+00> : vector<2x8x8xf32>
    %67 = tpu.matmul %66, %51, %cst_20 {dimension_numbers = #tpu.dot_dimension_numbers<[2], [1], [1], [2], [0, 0, 0, 1, 1, 2], [0], [0]>} : vector<2x8x8xf32>, vector<2x8x8xf32>, vector<2x8x8xf32> -> vector<2x8x8xf32>
    "tpu.trace_stop"() : () -> ()
    %68 = vector.extract_strided_slice %4 {offsets = [0, 0, 24], sizes = [2, 8, 8], strides = [1, 1, 1]} : vector<2x8x96xf32> to vector<2x8x8xf32>
    %69 = vector.extract_strided_slice %4 {offsets = [0, 0, 56], sizes = [2, 8, 8], strides = [1, 1, 1]} : vector<2x8x96xf32> to vector<2x8x8xf32>
    %70 = vector.extract_strided_slice %4 {offsets = [0, 0, 88], sizes = [2, 8, 8], strides = [1, 1, 1]} : vector<2x8x96xf32> to vector<2x8x8xf32>
    "tpu.trace_start"() <{level = 10 : i32, message = "bqd,bkd->bqk"}> : () -> ()
    %cst_21 = arith.constant dense<0.000000e+00> : vector<2x8x8xf32>
    %71 = tpu.matmul %68, %69, %cst_21 {dimension_numbers = #tpu.dot_dimension_numbers<[2], [2], [1], [1], [0, 0, 0, 1, 1, 1], [0], [0]>} : vector<2x8x8xf32>, vector<2x8x8xf32>, vector<2x8x8xf32> -> vector<2x8x8xf32>
    "tpu.trace_stop"() : () -> ()
    %72 = vector.shape_cast %10 : vector<8x8xf32> to vector<1x8x8xf32>
    %73 = vector.broadcast %72 : vector<1x8x8xf32> to vector<2x8x8xf32>
    %74 = arith.addf %71, %73 : vector<2x8x8xf32>
    %cst_22 = arith.constant dense<0xFF800000> : vector<2x8xf32>
    %75 = vector.multi_reduction <maximumf>, %74, %cst_22 [2] : vector<2x8x8xf32> to vector<2x8xf32>
    %76 = vector.shape_cast %75 : vector<2x8xf32> to vector<2x8x1xf32>
    %77 = vector.broadcast %76 : vector<2x8x1xf32> to vector<2x8x8xf32>
    %78 = arith.subf %74, %77 : vector<2x8x8xf32>
    %79 = math.exp %78 : vector<2x8x8xf32>
    %cst_23 = arith.constant dense<0.000000e+00> : vector<2x8xf32>
    %80 = vector.multi_reduction <add>, %79, %cst_23 [2] : vector<2x8x8xf32> to vector<2x8xf32>
    %81 = vector.shape_cast %80 : vector<2x8xf32> to vector<2x8x1xf32>
    %cst_24 = arith.constant 1.000000e+00 : f32
    %82 = vector.broadcast %cst_24 : f32 to vector<2x8x1xf32>
    %83 = arith.divf %82, %81 : vector<2x8x1xf32>
    %84 = vector.broadcast %83 : vector<2x8x1xf32> to vector<2x8x8xf32>
    %85 = arith.mulf %79, %84 : vector<2x8x8xf32>
    "tpu.trace_start"() <{level = 10 : i32, message = "bqk,bkd->bqd"}> : () -> ()
    %cst_25 = arith.constant dense<0.000000e+00> : vector<2x8x8xf32>
    %86 = tpu.matmul %85, %70, %cst_25 {dimension_numbers = #tpu.dot_dimension_numbers<[2], [1], [1], [2], [0, 0, 0, 1, 1, 2], [0], [0]>} : vector<2x8x8xf32>, vector<2x8x8xf32>, vector<2x8x8xf32> -> vector<2x8x8xf32>
    "tpu.trace_stop"() : () -> ()
    %87 = tpu.concatenate %29, %48, %67, %86 in 2 : vector<2x8x8xf32>, vector<2x8x8xf32>, vector<2x8x8xf32>, vector<2x8x8xf32> -> vector<2x8x32xf32>
    %88 = vector.shape_cast %87 : vector<2x8x32xf32> to vector<16x32xf32>
    %c0_26 = arith.constant 0 : index
    %c0_27 = arith.constant 0 : index
    %89 = vector.load %arg3[%c0_26, %c0_27] : memref<32x32xf32, #tpu.memory_space<vmem>>, vector<32x32xf32>
    %cst_28 = arith.constant dense<0.000000e+00> : vector<16x32xf32>
    %90 = tpu.matmul %88, %89, %cst_28 {dimension_numbers = #tpu.dot_dimension_numbers<[1], [0], [0], [1], [0, 0, 1, 1], [], []>} : vector<16x32xf32>, vector<32x32xf32>, vector<16x32xf32> -> vector<16x32xf32>
    %91 = vector.shape_cast %90 : vector<16x32xf32> to vector<2x8x32xf32>
    %c0_29 = arith.constant 0 : index
    %c0_30 = arith.constant 0 : index
    %c0_31 = arith.constant 0 : index
    %92 = vector.load %arg4[%c0_29, %c0_30, %c0_31] : memref<2x8x32xf32, #tpu.memory_space<vmem>>, vector<2x8x32xf32>
    tpu.vector_store %arg4[%c0_29, %c0_30, %c0_31], %91 {strides = array<i32>} : memref<2x8x32xf32, #tpu.memory_space<vmem>>, vector<2x8x32xf32>,
    return
  }
  func.func @transform_0(%arg0: i32) -> (i32, i32, i32) {
    %c0_i32 = arith.constant 0 : i32
    %c0_i32_0 = arith.constant 0 : i32
    %c0_i32_1 = arith.constant 0 : i32
    %c0_i32_2 = arith.constant 0 : i32
    return %c0_i32, %c0_i32_0, %c0_i32_1 : i32, i32, i32
  }
  func.func @transform_1(%arg0: i32) -> (i32, i32) {
    %c0_i32 = arith.constant 0 : i32
    %c0_i32_0 = arith.constant 0 : i32
    %c0_i32_1 = arith.constant 0 : i32
    return %c0_i32, %c0_i32_0 : i32, i32
  }
  func.func @transform_2(%arg0: i32) -> (i32, i32) {
    %c0_i32 = arith.constant 0 : i32
    %c0_i32_0 = arith.constant 0 : i32
    %c0_i32_1 = arith.constant 0 : i32
    return %c0_i32, %c0_i32_0 : i32, i32
  }
  func.func @transform_3(%arg0: i32) -> (i32, i32, i32) {
    %c0_i32 = arith.constant 0 : i32
    %c0_i32_0 = arith.constant 0 : i32
    %c0_i32_1 = arith.constant 0 : i32
    %c0_i32_2 = arith.constant 0 : i32
    return %c0_i32, %c0_i32_0, %c0_i32_1 : i32, i32, i32
  }
}

</mosaic_0001>

<bundles_post_ra>
// kernel: tpu_custom_call.1
= control target key start
LH: loop header
LB: loop body
LE: loop exit
PB: predicated region body
PF: predicated region fallthrough
CT: control target
= control target key end

     0   :  { %8 = vsyncpa [#allocation3], 0  ;;  %s2209_s0 = inlined_call_operand.hbm [shape: f32[2,8,32], index: 0, kind: input, shape index: {}]   ;;  %s2210_s1 = inlined_call_operand.hbm [shape: f32[32,96], index: 1, kind: input, shape index: {}]   ;;  %s2211_s2 = inlined_call_operand.hbm [shape: f32[32,32], index: 2, kind: input, shape index: {}]   ;;  %s2212_s3 = inlined_call_operand.hbm [shape: f32[2,8,32], index: 3, kind: output, shape index: {}]  }
   0x1   :  { %9 = vsyncpa [#allocation6], 0 }
   0x2   :  { %10 = vsyncpa [#allocation4], 0  ;;  %s1952_s12 = smov [#allocation5]   ;;  %s1953_s14 = smov [#allocation2]  }
   0x3   :  { %s28_s13 = sshll.u32 %s1952_s12, 4  ;;  %s16_s15 = sshll.u32 %s1953_s14, 4  ;;  %s29_s13 = int_to_ptr.vmem [resolvable:$true] %s28_s13  ;;  %s1994_s15 = int_to_ptr.vmem [resolvable:$true] %s16_s15 }
   0x4   :  { %s1858_s18 = scalar_lea.hbm %s2210_s1, 512 }
   0x5   :  { %p1859_p0 = scmp.ne.s32.totalorder %s2210_s1, %s1858_s18  ;;  %p1862_p1 = scmp.lt.u32.totalorder %s1858_s18, %s2210_s1 }
   0x7   :  { %p1864_p2 = pnand %p1862_p1, %p1859_p0 }
   0x9   :  { %1867 = shalt.err (!%p1864_p2)
}
   0xa   :  { %s1868_s23 = scalar_lea.vmem %s29_s13, 512  ;;  %p1873_p4 = scmp.lt.s32.totalorder %s29_s13, %s29_s13 }
   0xb   :  { %p1869_p3 = scmp.ne.s32.totalorder %s29_s13, %s1868_s23  ;;  %p1874_p5 = scmp.lt.s32.totalorder %s1868_s23, %s1868_s23 }
   0xd   :  { %p1875_p6 = por %p1874_p5, %p1873_p4 }
   0xf   :  { %p1876_p7 = pnand %p1875_p6, %p1869_p3 }
  0x11   :  { %1879 = shalt.err (!%p1876_p7)
}
  0x12   :  { %s1954_s24 = smov 128   ;;  %s1955_s25 = smov 8  }
  0x13   :  { %34 = dma.hbm_to_vmem [thread:$0]  %s2210_s1, 512, %s29_s13, [#allocation6], %s1954_s24, %s1954_s24, %s1955_s25  }
  0x14   :  { %s1880_s30 = scalar_lea.hbm %s2209_s0, 256 }
  0x15   :  { %p1881_p8 = scmp.ne.s32.totalorder %s2209_s0, %s1880_s30  ;;  %p1884_p9 = scmp.lt.u32.totalorder %s1880_s30, %s2209_s0 }
  0x17   :  { %p1886_p10 = pnand %p1884_p9, %p1881_p8 }
  0x19   :  { %1889 = shalt.err (!%p1886_p10)
}
  0x1a   :  { %s1890_s8 = scalar_lea.vmem %s1994_s15, 256  ;;  %p1895_p12 = scmp.lt.s32.totalorder %s1994_s15, %s1994_s15 }
  0x1b   :  { %p1891_p11 = scmp.ne.s32.totalorder %s1994_s15, %s1890_s8  ;;  %p1896_p13 = scmp.lt.s32.totalorder %s1890_s8, %s1890_s8 }
  0x1d   :  { %p1897_p0 = por %p1896_p13, %p1895_p12 }
  0x1f   :  { %p1898_p1 = pnand %p1897_p0, %p1891_p11 }
  0x21   :  { %1901 = shalt.err (!%p1898_p1)
}
  0x22   :  { %22 = dma.hbm_to_vmem [thread:$0]  %s2209_s0, 256, %s1994_s15, [#allocation3], %s1954_s24, %s1954_s24, %s1955_s25  }
  0x23   :  { %s1956_s10 = smov [#allocation7]   ;;  %s1902_s14 = scalar_lea.hbm %s2211_s2, 512 }
  0x24   :  { %s40_s11 = sshll.u32 %s1956_s10, 4  ;;  %p1903_p2 = scmp.ne.s32.totalorder %s2211_s2, %s1902_s14  ;;  %s41_s11 = int_to_ptr.vmem [resolvable:$true] %s40_s11 }
  0x25   :  { %p1906_p3 = scmp.lt.u32.totalorder %s1902_s14, %s2211_s2 }
  0x27   :  { %p1908_p4 = pnand %p1906_p3, %p1903_p2 }
  0x29   :  { %1911 = shalt.err (!%p1908_p4)
}
  0x2a   :  { %s1912_s20 = scalar_lea.vmem %s41_s11, 512  ;;  %p1917_p6 = scmp.lt.s32.totalorder %s41_s11, %s41_s11 }
  0x2b   :  { %p1913_p5 = scmp.ne.s32.totalorder %s41_s11, %s1912_s20  ;;  %p1918_p7 = scmp.lt.s32.totalorder %s1912_s20, %s1912_s20 }
  0x2d   :  { %p1919_p8 = por %p1918_p7, %p1917_p6 }
  0x2f   :  { %p1920_p9 = pnand %p1919_p8, %p1913_p5 }
  0x31   :  { %1923 = shalt.err (!%p1920_p9)
}
  0x32   :  { %46 = dma.hbm_to_vmem [thread:$0]  %s2211_s2, 512, %s41_s11, [#allocation6], %s1954_s24, %s1954_s24, %s1955_s25  }
  0x33   :  { %1946 = dma.done.wait [#allocation3], 256  }
  0x34   :  { %1947 = vsyncadd [#allocation3], 4294967040 }
  0x35   :  { %1948 = dma.done.wait [#allocation6], 1024  }
  0x36   :  { %1949 = vsyncadd [#allocation6], 4294966272  ;;  %vm62_vm0 = vcmask 261120   ;;  %v58_v0 = vld [vmem:[#allocation5] sm:$0xff]  ;;  %v59_v1 = vld [vmem:[#allocation5 + $0x8] sm:$0xff]  ;;  %v1957_v8 = vmov 0.0   ;;  %v144_v13 = vlaneseq }
  0x37   :  { %v60_v2 = vld [vmem:[#allocation5 + $0x10] sm:$0xff]  ;;  %v1788_v3 = vpack.c.bf16 %v59_v1, %v58_v0  ;;  %v61_v4 = vld [vmem:[#allocation5 + $0x18] sm:$0xff]  ;;  %1697 = vmatprep.subr.mxu1 %v1957_v8  ;;  %vm1958_vm1 = vmmov 0   ;;  %s1959_s2 = smov 96   ;;  %vm153_vm2 = vcmask 64512   ;;  %s1961_s21 = smov 64  }
  0x38   :  { %v56_v5 = vld [vmem:[#allocation2] sm:$0xff]  ;;  %v1792_v6 = vpack.c.bf16 %v61_v4, %v60_v2  ;;  %v57_v7 = vld [vmem:[#allocation2 + $0x8] sm:$0xff]  ;;  %1699 = vmatprep.mubr.msk.f32.mxu1 %vm1958_vm1, %v1957_v8  ;;  %v145_v14 = vshrl.u32 %v144_v13, 7  ;;  %v147_v15 = vand.u32 127, %v144_v13  ;;  %v1960_v16 = vmov -1e+30  }
  0x39   :  { %1694 = vmatprep.mubr.msk.f32.mxu0 %vm62_vm0, %v56_v5  ;;  %1789 = vmatprep.subr.bf16.mxu0 %v1788_v3  ;;  %s1962_s22 = smov 88   ;;  %s1963_s23 = smov 120   ;;  %vm1506_vm4 = vcmask 195584   ;;  %vm1503_vm5 = vcmask 130048  }
  0x3a   :  { %1791 = vmatpush3.bf16.msra.mxu0 %v1788_v3  ;;  %vm148_vm3 = vcmp.le.s32.totalorder %v147_v15, %v145_v14  ;;  %s1964_s26 = smov 56   ;;  %s1965_s27 = smov 112  }
  0x3b   :  { %1793 = vmatprep.subr.bf16.mxu0 %v1792_v6  ;;  %v2072_v17 = vsel %vm148_vm3, 0.0, %v1960_v16  ;;  %s1966_s28 = smov 80   ;;  %s1967_s29 = smov 48  }
  0x3c   :  { %s1968_s30 = smov 72   ;;  %s1969_s4 = smov 104  }
  0x3d   :  { %s1970_s5 = smov 40   ;;  %s1971_s6 = smov 16  }
  0x3e   :  { %1795 = vmatpush3.bf16.msra.mxu0 %v1792_v6  ;;  %s1972_s7 = smov 24   ;;  %s1973_s8 = smov [#allocation8]  }
  0x3f   :  { %1717 = vmatprep.subr.mxu0 %v1957_v8  ;;  %s1601_s1 = sshll.u32 %s1973_s8, 4  ;;  %s1602_s1 = int_to_ptr.vmem [resolvable:$true] %s1601_s1 }
  0x40   :  { %s1924_s9 = scalar_lea.vmem %s1602_s1, 256  ;;  %p1929_p11 = scmp.lt.s32.totalorder %s1602_s1, %s1602_s1 }
  0x41   :  { %1695 = vmatmul.mubr.msk.f32.vlgmr.msra.gmra.mrb[0].mxu0 %vm62_vm0, %v57_v7  ;;  %p1925_p10 = scmp.ne.s32.totalorder %s1602_s1, %s1924_s9  ;;  %p1930_p12 = scmp.lt.s32.totalorder %s1924_s9, %s1924_s9 }
  0x42   :  { %1719 = vmatprep.mubr.msk.f32.mxu0 %vm1958_vm1, %v1957_v8 }
  0x43   :  { %p1931_p13 = por %p1930_p12, %p1929_p11 }
  0x45   :  { %p1932_p0 = pnand %p1931_p13, %p1925_p10 }
 0x114   :  { %v2054_v9 = vpop.f32.mrb[0].mxu0 }
 0x115   :  { %v2056_v10 = vpop.f32.mrb[1].mxu0 }
 0x116   :  { %151 = vrot.lane.b32.xlu0 %v2056_v10, %s1959_s2 }
 0x11a   :  { %229 = vrot.lane.b32.xlu0 %v2054_v9, %s1959_s2 }
 0x188   :  { %v152_v11 = vpop.permute.xlu0 %151 }
 0x189   :  { %1698 = vmatpush3.xpose.msk.msra.mxu1 %vm153_vm2, %v152_v11 }
 0x18a   :  { %1702 = vmatprep.subr.mxu1 %v1957_v8 }
 0x18c   :  { %1700 = vmatmul.mubr.msk.f32.vlgmr.msra.gmra.mrb[0].mxu1 %vm153_vm2, %v2056_v10  ;;  %v230_v12 = vpop.permute.xlu0 %229 }
 0x18d   :  { %1703 = vmatpush3.xpose.msk.msra.mxu1 %vm153_vm2, %v230_v12  ;;  %1704 = vmatprep.mubr.msk.f32.mxu1 %vm1958_vm1, %v1957_v8 }
 0x18e   :  { %1707 = vmatprep.subr.mxu1 %v1957_v8 }
 0x190   :  { %1705 = vmatmul.mubr.msk.f32.vlgmr.msra.gmra.mrb[2].mxu1 %vm153_vm2, %v2054_v9 }
 0x191   :  { %1709 = vmatprep.mubr.msk.f32.mxu1 %vm1958_vm1, %v1957_v8 }
 0x25f   :  { %v224_v18 = vpop.f32.mrb[0].mxu1 }
 0x260   :  { %v225_v19 = vadd.f32 %v224_v18, %v2072_v17  ;;  %v1701_v20 = vpop.f32.mrb[1].mxu1 }
 0x262   :  { %v305_v21 = vsel %vm153_vm2, %v225_v19, -inf }
 0x263   :  { %306 = vmax.xlane.f32.xlu1 %v305_v21  ;;  %v301_v22 = vpop.f32.mrb[2].mxu1 }
 0x264   :  { %v302_v23 = vadd.f32 %v301_v22, %v2072_v17  ;;  %v1706_v24 = vpop.f32.mrb[3].mxu1 }
 0x266   :  { %v308_v25 = vsel %vm153_vm2, %v302_v23, -inf }
 0x267   :  { %309 = vmax.xlane.f32.xlu1 %v308_v25 }
 0x278   :  { %329 = vrot.lane.b32.xlu1 %v2056_v10, %s1961_s21 }
 0x27c   :  { %405 = vrot.lane.b32.xlu1 %v2054_v9, %s1961_s21 }
 0x280   :  { %483 = vrot.lane.b32.xlu1 %v2056_v10, %s1962_s22 }
 0x284   :  { %561 = vrot.lane.b32.xlu1 %v2054_v9, %s1962_s22 }
 0x2f0   :  { %v307_v26 = vpop.xlane.xlu1 %306 }
 0x2f1   :  { %v311_v27 = vsub.f32 %v225_v19, %v307_v26 }
 0x2f3   :  { %v313_v28 = vmul.f32 1.442695, %v311_v27 }
 0x2f4   :  { %v310_v29 = vpop.xlane.xlu1 %309 }
 0x2f5   :  { %1826 = vpow2.f32 %v313_v28  ;;  %v312_v30 = vsub.f32 %v302_v23, %v310_v29 }
 0x2f7   :  { %v315_v31 = vmul.f32 1.442695, %v312_v30 }
 0x2f8   :  { %v330_v32 = vpop.permute.xlu1 %329 }
 0x2f9   :  { %1828 = vpow2.f32 %v315_v31  ;;  %1708 = vmatpush3.msra.mxu1 %v330_v32 }
 0x2fa   :  { %1712 = vmatprep.subr.mxu1 %v1957_v8 }
 0x2fc   :  { %v406_v33 = vpop.permute.xlu1 %405 }
 0x2ff   :  { %v1827_v34 = vpop.eup %1826 }
 0x300   :  { %v484_v35 = vpop.permute.xlu1 %483  ;;  %v317_v36 = vsel %vm153_vm2, %v1827_v34, 0.0 }
 0x301   :  { %318 = vadd.xlane.f32.xlu0 %v317_v36  ;;  %1718 = vmatpush3.xpose.msk.msra.mxu0 %vm153_vm2, %v484_v35 }
 0x302   :  { %1727 = vmatprep.subr.mxu0 %v1957_v8 }
 0x303   :  { %v1829_v37 = vpop.eup %1828 }
 0x304   :  { %v320_v38 = vsel %vm153_vm2, %v1829_v37, 0.0  ;;  %v562_v39 = vpop.permute.xlu1 %561 }
 0x305   :  { %321 = vadd.xlane.f32.xlu1 %v320_v38 }
 0x316   :  { %559 = vrot.lane.b32.xlu1 %v2054_v9, %s1963_s23 }
 0x317   :  { %481 = vrot.lane.b32.xlu0 %v2056_v10, %s1963_s23 }
 0x38e   :  { %v319_v40 = vpop.xlane.xlu0 %318 }
 0x38f   :  { %1830 = vrcp.f32 %v319_v40 }
 0x392   :  { %v322_v41 = vpop.xlane.xlu1 %321  ;;  %v482_v42 = vpop.permute.xlu0 %481 }
 0x393   :  { %1832 = vrcp.f32 %v322_v41  ;;  %1720 = vmatmul.mubr.msk.f32.vlgmr.msra.gmra.mrb[2].mxu0 %vm153_vm2, %v482_v42 }
 0x394   :  { %1729 = vmatprep.mubr.msk.f32.mxu0 %vm1958_vm1, %v1957_v8 }
 0x396   :  { %v560_v47 = vpop.permute.xlu1 %559 }
 0x399   :  { %v1831_v43 = vpop.eup %1830 }
 0x39a   :  { %v327_v44 = vmul.f32 %v1831_v43, %v1827_v34 }
 0x39c   :  { %1710 = vmatmul.mubr.msk.f32.vlgmr.msra.gmra.mrb[4].mxu1 %vm153_vm2, %v327_v44 }
 0x39d   :  { %v1833_v45 = vpop.eup %1832  ;;  %1713 = vmatpush3.msra.mxu1 %v406_v33  ;;  %1714 = vmatprep.mubr.msk.f32.mxu1 %vm1958_vm1, %v1957_v8 }
 0x39e   :  { %v328_v46 = vmul.f32 %v1833_v45, %v1829_v37  ;;  %1722 = vmatprep.subr.mxu1 %v1957_v8 }
 0x3a0   :  { %1715 = vmatmul.mubr.msk.f32.vlgmr.msra.gmra.mrb[6].mxu1 %vm153_vm2, %v328_v46 }
 0x3a1   :  { %1724 = vmatprep.mubr.msk.f32.mxu1 %vm1958_vm1, %v1957_v8 }
 0x3a4   :  { %1723 = vmatpush3.xpose.msk.msra.mxu1 %vm153_vm2, %v562_v39 }
 0x3a5   :  { %1732 = vmatprep.subr.mxu1 %v1957_v8 }
 0x3a7   :  { %1725 = vmatmul.mubr.msk.f32.vlgmr.msra.gmra.mrb[8].mxu1 %vm153_vm2, %v560_v47 }
 0x3a8   :  { %1734 = vmatprep.mubr.msk.f32.mxu1 %vm1958_vm1, %v1957_v8 }
 0x466   :  { %v555_v48 = vpop.f32.mrb[2].mxu0 }
 0x467   :  { %v556_v49 = vadd.f32 %v555_v48, %v2072_v17  ;;  %v1721_v50 = vpop.f32.mrb[3].mxu0 }
 0x469   :  { %v637_v51 = vsel %vm153_vm2, %v556_v49, -inf }
 0x46a   :  { %638 = vmax.xlane.f32.xlu1 %v637_v51 }
 0x46f   :  { %v2106_v52 = vpop.f32.mrb[4].mxu1 }
 0x470   :  { %v1711_v53 = vpop.f32.mrb[5].mxu1 }
 0x473   :  { %v2108_v54 = vpop.f32.mrb[6].mxu1 }
 0x474   :  { %v1716_v55 = vpop.f32.mrb[7].mxu1 }
 0x47a   :  { %v633_v56 = vpop.f32.mrb[8].mxu1 }
 0x47b   :  { %v634_v57 = vadd.f32 %v633_v56, %v2072_v17  ;;  %v1726_v58 = vpop.f32.mrb[9].mxu1 }
 0x47d   :  { %v640_v59 = vsel %vm153_vm2, %v634_v57, -inf }
 0x47e   :  { %641 = vmax.xlane.f32.xlu0 %v640_v59 }
 0x494   :  { %737 = vrot.lane.b32.xlu0 %v2054_v9, %s1964_s26 }
 0x498   :  { %813 = vrot.lane.b32.xlu0 %v2056_v10, %s1965_s27 }
 0x4f7   :  { %v639_v60 = vpop.xlane.xlu1 %638 }
 0x4f8   :  { %v643_v61 = vsub.f32 %v556_v49, %v639_v60 }
 0x4fa   :  { %v645_v62 = vmul.f32 1.442695, %v643_v61 }
 0x4fc   :  { %1834 = vpow2.f32 %v645_v62 }
 0x506   :  { %v1835_v63 = vpop.eup %1834 }
 0x507   :  { %v649_v0 = vsel %vm153_vm2, %v1835_v63, 0.0 }
 0x508   :  { %650 = vadd.xlane.f32.xlu1 %v649_v0 }
 0x50b   :  { %v642_v1 = vpop.xlane.xlu0 %641 }
 0x50c   :  { %v644_v3 = vsub.f32 %v634_v57, %v642_v1 }
 0x50e   :  { %v647_v4 = vmul.f32 1.442695, %v644_v3 }
 0x50f   :  { %v738_v2 = vpop.permute.xlu0 %737 }
 0x510   :  { %1733 = vmatpush3.msra.mxu1 %v738_v2  ;;  %1836 = vpow2.f32 %v647_v4 }
 0x511   :  { %1742 = vmatprep.subr.mxu1 %v1957_v8 }
 0x513   :  { %v814_v15 = vpop.permute.xlu0 %813 }
 0x519   :  { %661 = vrot.lane.b32.xlu1 %v2056_v10, %s1964_s26 }
 0x51a   :  { %v1837_v5 = vpop.eup %1836 }
 0x51b   :  { %v652_v6 = vsel %vm153_vm2, %v1837_v5, 0.0 }
 0x51d   :  { %815 = vrot.lane.b32.xlu1 %v2056_v10, %s1966_s28 }
 0x521   :  { %893 = vrot.lane.b32.xlu1 %v2054_v9, %s1966_s28 }
 0x545   :  { %653 = vadd.xlane.f32.xlu1 %v652_v6 }
 0x556   :  { %891 = vrot.lane.b32.xlu1 %v2054_v9, %s1965_s27 }
 0x595   :  { %v651_v7 = vpop.xlane.xlu1 %650 }
 0x596   :  { %1838 = vrcp.f32 %v651_v7 }
 0x599   :  { %v662_v11 = vpop.permute.xlu1 %661 }
 0x59a   :  { %1728 = vmatpush3.msra.mxu0 %v662_v11 }
 0x59b   :  { %1737 = vmatprep.subr.mxu0 %v1957_v8 }
 0x59d   :  { %v816_v14 = vpop.permute.xlu1 %815 }
 0x5a0   :  { %v1839_v12 = vpop.eup %1838 }
 0x5a1   :  { %v659_v13 = vmul.f32 %v1839_v12, %v1835_v63  ;;  %v894_v16 = vpop.permute.xlu1 %893 }
 0x5a3   :  { %1730 = vmatmul.mubr.msk.f32.vlgmr.msra.gmra.mrb[4].mxu0 %vm153_vm2, %v659_v13 }
 0x5a4   :  { %1738 = vmatpush3.xpose.msk.msra.mxu0 %vm153_vm2, %v816_v14  ;;  %1739 = vmatprep.mubr.msk.f32.mxu0 %vm1958_vm1, %v1957_v8 }
 0x5a5   :  { %1747 = vmatprep.subr.mxu0 %v1957_v8 }
 0x5a7   :  { %1740 = vmatmul.mubr.msk.f32.vlgmr.msra.gmra.mrb[6].mxu0 %vm153_vm2, %v814_v15 }
 0x5a8   :  { %1749 = vmatprep.mubr.msk.f32.mxu0 %vm1958_vm1, %v1957_v8 }
 0x5d2   :  { %v654_v18 = vpop.xlane.xlu1 %653 }
 0x5d3   :  { %1840 = vrcp.f32 %v654_v18 }
 0x5d6   :  { %v892_v21 = vpop.permute.xlu1 %891 }
 0x5dd   :  { %v1841_v19 = vpop.eup %1840 }
 0x5de   :  { %v660_v20 = vmul.f32 %v1841_v19, %v1837_v5 }
 0x5e0   :  { %1735 = vmatmul.mubr.msk.f32.vlgmr.msra.gmra.mrb[10].mxu1 %vm153_vm2, %v660_v20 }
 0x5e1   :  { %1743 = vmatpush3.xpose.msk.msra.mxu1 %vm153_vm2, %v894_v16  ;;  %1744 = vmatprep.mubr.msk.f32.mxu1 %vm1958_vm1, %v1957_v8 }
 0x5e2   :  { %1752 = vmatprep.subr.mxu1 %v1957_v8 }
 0x5e4   :  { %1745 = vmatmul.mubr.msk.f32.vlgmr.msra.gmra.mrb[12].mxu1 %vm153_vm2, %v892_v21 }
 0x5e5   :  { %1754 = vmatprep.mubr.msk.f32.mxu1 %vm1958_vm1, %v1957_v8 }
 0x676   :  { %v2138_v22 = vpop.f32.mrb[4].mxu0 }
 0x677   :  { %v1731_v23 = vpop.f32.mrb[5].mxu0 }
 0x67a   :  { %v887_v24 = vpop.f32.mrb[6].mxu0 }
 0x67b   :  { %v888_v25 = vadd.f32 %v887_v24, %v2072_v17  ;;  %v1741_v26 = vpop.f32.mrb[7].mxu0 }
 0x67c   :  { %v1510_v26 = vld [vmem:[#allocation7 + $0x8] sm:$0xff] }
 0x67d   :  { %v969_v27 = vsel %vm153_vm2, %v888_v25, -inf }
 0x67e   :  { %970 = vmax.xlane.f32.xlu0 %v969_v27  ;;  %v1511_v27 = vld [vmem:[#allocation7 + $0x10] sm:$0xff] }
 0x6b3   :  { %v2142_v28 = vpop.f32.mrb[10].mxu1 }
 0x6b4   :  { %v1736_v29 = vpop.f32.mrb[11].mxu1 }
 0x6b7   :  { %v965_v30 = vpop.f32.mrb[12].mxu1 }
 0x6b8   :  { %v966_v31 = vadd.f32 %v965_v30, %v2072_v17  ;;  %v1746_v32 = vpop.f32.mrb[13].mxu1 }
 0x6ba   :  { %v972_v33 = vsel %vm153_vm2, %v966_v31, -inf }
 0x6bb   :  { %973 = vmax.xlane.f32.xlu1 %v972_v33 }
 0x6cc   :  { %993 = vrot.lane.b32.xlu1 %v2056_v10, %s1967_s29 }
 0x6d0   :  { %1147 = vrot.lane.b32.xlu1 %v2056_v10, %s1968_s30 }
 0x6d4   :  { %1225 = vrot.lane.b32.xlu1 %v2054_v9, %s1968_s30 }
 0x6d8   :  { %1223 = vrot.lane.b32.xlu1 %v2054_v9, %s1969_s4 }
 0x70b   :  { %v971_v34 = vpop.xlane.xlu0 %970 }
 0x70c   :  { %v975_v35 = vsub.f32 %v888_v25, %v971_v34  ;;  %v1509_v25 = vld [vmem:[#allocation7] sm:$0xff] }
 0x70e   :  { %v977_v36 = vmul.f32 1.442695, %v975_v35 }
 0x710   :  { %1842 = vpow2.f32 %v977_v36 }
 0x71a   :  { %v1843_v37 = vpop.eup %1842 }
 0x71b   :  { %v981_v38 = vsel %vm153_vm2, %v1843_v37, 0.0 }
 0x71c   :  { %982 = vadd.xlane.f32.xlu0 %v981_v38 }
 0x732   :  { %1069 = vrot.lane.b32.xlu0 %v2054_v9, %s1967_s29 }
 0x748   :  { %v974_v39 = vpop.xlane.xlu1 %973 }
 0x749   :  { %v976_v40 = vsub.f32 %v966_v31, %v974_v39 }
 0x74b   :  { %v979_v41 = vmul.f32 1.442695, %v976_v40 }
 0x74c   :  { %v994_v42 = vpop.permute.xlu1 %993 }
 0x74d   :  { %1844 = vpow2.f32 %v979_v41  ;;  %1748 = vmatpush3.msra.mxu0 %v994_v42 }
 0x74e   :  { %1757 = vmatprep.subr.mxu0 %v1957_v8 }
 0x750   :  { %v1148_v49 = vpop.permute.xlu1 %1147 }
 0x754   :  { %v1226_v55 = vpop.permute.xlu1 %1225 }
 0x757   :  { %v1845_v43 = vpop.eup %1844 }
 0x758   :  { %v984_v44 = vsel %vm153_vm2, %v1845_v43, 0.0  ;;  %v1224_v57 = vpop.permute.xlu1 %1223 }
 0x759   :  { %985 = vadd.xlane.f32.xlu0 %v984_v44 }
 0x76f   :  { %1145 = vrot.lane.b32.xlu0 %v2056_v10, %s1969_s4 }
 0x7a9   :  { %v983_v45 = vpop.xlane.xlu0 %982 }
 0x7aa   :  { %1846 = vrcp.f32 %v983_v45 }
 0x7ad   :  { %v1070_v46 = vpop.permute.xlu0 %1069 }
 0x7ae   :  { %1753 = vmatpush3.msra.mxu1 %v1070_v46 }
 0x7af   :  { %1762 = vmatprep.subr.mxu1 %v1957_v8 }
 0x7b4   :  { %v1847_v47 = vpop.eup %1846 }
 0x7b5   :  { %v991_v48 = vmul.f32 %v1847_v47, %v1843_v37 }
 0x7b7   :  { %1750 = vmatmul.mubr.msk.f32.vlgmr.msra.gmra.mrb[8].mxu0 %vm153_vm2, %v991_v48 }
 0x7b8   :  { %1758 = vmatpush3.xpose.msk.msra.mxu0 %vm153_vm2, %v1148_v49  ;;  %1759 = vmatprep.mubr.msk.f32.mxu0 %vm1958_vm1, %v1957_v8 }
 0x7b9   :  { %1767 = vmatprep.subr.mxu0 %v1957_v8 }
 0x7e6   :  { %v986_v50 = vpop.xlane.xlu0 %985 }
 0x7e7   :  { %1848 = vrcp.f32 %v986_v50 }
 0x7ea   :  { %v1146_v51 = vpop.permute.xlu0 %1145 }
 0x7eb   :  { %1760 = vmatmul.mubr.msk.f32.vlgmr.msra.gmra.mrb[10].mxu0 %vm153_vm2, %v1146_v51 }
 0x7ec   :  { %1769 = vmatprep.mubr.msk.f32.mxu0 %vm1958_vm1, %v1957_v8 }
 0x7f1   :  { %v1849_v53 = vpop.eup %1848 }
 0x7f2   :  { %v992_v56 = vmul.f32 %v1849_v53, %v1845_v43 }
 0x7f4   :  { %1755 = vmatmul.mubr.msk.f32.vlgmr.msra.gmra.mrb[14].mxu1 %vm153_vm2, %v992_v56 }
 0x7f5   :  { %1763 = vmatpush3.xpose.msk.msra.mxu1 %vm153_vm2, %v1226_v55  ;;  %1764 = vmatprep.mubr.msk.f32.mxu1 %vm1958_vm1, %v1957_v8 }
 0x7f6   :  { %1772 = vmatprep.subr.mxu1 %v1957_v8 }
 0x7f8   :  { %1765 = vmatmul.mubr.msk.f32.vlgmr.msra.gmra.mrb[16].mxu1 %vm153_vm2, %v1224_v57 }
 0x7f9   :  { %1774 = vmatprep.mubr.msk.f32.mxu1 %vm1958_vm1, %v1957_v8 }
 0x88a   :  { %v1065_v58 = vpop.f32.mrb[8].mxu0 }
 0x88b   :  { %v1751_v59 = vpop.f32.mrb[9].mxu0 }
 0x8be   :  { %v1219_v60 = vpop.f32.mrb[10].mxu0 }
 0x8bf   :  { %v1220_v61 = vadd.f32 %v1219_v60, %v2072_v17  ;;  %v1761_v62 = vpop.f32.mrb[11].mxu0 }
 0x8c1   :  { %v1301_v63 = vsel %vm153_vm2, %v1220_v61, -inf }
 0x8c2   :  { %1302 = vmax.xlane.f32.xlu0 %v1301_v63 }
 0x8c7   :  { %v1141_v0 = vpop.f32.mrb[14].mxu1 }
 0x8c8   :  { %v1756_v1 = vpop.f32.mrb[15].mxu1 }
 0x8cb   :  { %v1297_v2 = vpop.f32.mrb[16].mxu1 }
 0x8cc   :  { %v1298_v3 = vadd.f32 %v1297_v2, %v2072_v17  ;;  %v1766_v4 = vpop.f32.mrb[17].mxu1 }
 0x8ce   :  { %v1304_v5 = vsel %vm153_vm2, %v1298_v3, -inf }
 0x8cf   :  { %1305 = vmax.xlane.f32.xlu1 %v1304_v5 }
 0x8e0   :  { %1325 = vrot.lane.b32.xlu1 %v2056_v10, %s1970_s5 }
 0x8e4   :  { %1479 = vrot.lane.b32.xlu1 %v2138_v22, %s1955_s25 }
 0x8e8   :  { %1481 = vrot.lane.b32.xlu1 %v2142_v28, %s1955_s25  ;;  %v1796_v28 = vpack.c.bf16 %v1510_v26, %v1509_v25 }
 0x8ec   :  { %1489 = vrot.lane.b32.xlu1 %v1141_v0, %s1971_s6 }
 0x94f   :  { %v1303_v8 = vpop.xlane.xlu0 %1302 }
 0x950   :  { %v1307_v6 = vsub.f32 %v1220_v61, %v1303_v8 }
 0x952   :  { %v1309_v7 = vmul.f32 1.442695, %v1307_v6 }
 0x954   :  { %1850 = vpow2.f32 %v1309_v7 }
 0x95c   :  { %v1306_v17 = vpop.xlane.xlu1 %1305 }
 0x95d   :  { %v1308_v11 = vsub.f32 %v1298_v3, %v1306_v17 }
 0x95e   :  { %v1851_v12 = vpop.eup %1850 }
 0x95f   :  { %v1311_v13 = vmul.f32 1.442695, %v1308_v11  ;;  %v1313_v14 = vsel %vm153_vm2, %v1851_v12, 0.0 }
 0x960   :  { %v1326_v15 = vpop.permute.xlu1 %1325  ;;  %1314 = vadd.xlane.f32.xlu0 %v1313_v14 }
 0x961   :  { %1852 = vpow2.f32 %v1311_v13  ;;  %1768 = vmatpush3.msra.mxu0 %v1326_v15 }
 0x962   :  { %1797 = vmatprep.subr.bf16.mxu0 %v1796_v28 }
 0x964   :  { %v1480_v34 = vpop.permute.xlu1 %1479 }
 0x965   :  { %v1501_v36 = vsel %vm153_vm2, %v2106_v52, %v1480_v34 }
 0x968   :  { %v1482_v40 = vpop.permute.xlu1 %1481 }
 0x969   :  { %v1502_v42 = vsel %vm153_vm2, %v2108_v54, %v1482_v40 }
 0x96b   :  { %v1853_v10 = vpop.eup %1852 }
 0x96c   :  { %v1316_v16 = vsel %vm153_vm2, %v1853_v10, 0.0  ;;  %v1490_v41 = vpop.permute.xlu1 %1489 }
 0x96d   :  { %1317 = vadd.xlane.f32.xlu0 %v1316_v16  ;;  %v1505_v43 = vsel %vm1503_vm5, %v1502_v42, %v1490_v41 }
 0x983   :  { %1401 = vrot.lane.b32.xlu0 %v2054_v9, %s1970_s5  ;;  %v1512_v9 = vld [vmem:[#allocation7 + $0x18] sm:$0xff] }
 0x984   :  { %v1800_v29 = vpack.c.bf16 %v1512_v9, %v1511_v27 }
 0x987   :  { %1487 = vrot.lane.b32.xlu0 %v1065_v58, %s1971_s6 }
 0x9ed   :  { %v1315_v18 = vpop.xlane.xlu0 %1314 }
 0x9ee   :  { %1854 = vrcp.f32 %v1315_v18 }
 0x9f8   :  { %v1855_v19 = vpop.eup %1854 }
 0x9f9   :  { %v1323_v20 = vmul.f32 %v1855_v19, %v1851_v12 }
 0x9fa   :  { %v1318_v21 = vpop.xlane.xlu0 %1317 }
 0x9fb   :  { %1856 = vrcp.f32 %v1318_v21  ;;  %1770 = vmatmul.mubr.msk.f32.vlgmr.msra.gmra.mrb[12].mxu0 %vm153_vm2, %v1323_v20 }
 0x9fc   :  { %1799 = vmatpush3.bf16.msra.mxu0 %v1796_v28 }
 0x9fd   :  { %1801 = vmatprep.subr.bf16.mxu0 %v1800_v29 }
 0x9fe   :  { %v1402_v22 = vpop.permute.xlu0 %1401 }
 0x9ff   :  { %1773 = vmatpush3.msra.mxu1 %v1402_v22 }
 0xa00   :  { %1803 = vmatpush3.bf16.msra.mxu0 %v1800_v29 }
 0xa02   :  { %v1488_v35 = vpop.permute.xlu0 %1487 }
 0xa03   :  { %v1504_v37 = vsel %vm1503_vm5, %v1501_v36, %v1488_v35 }
 0xa05   :  { %v1857_v23 = vpop.eup %1856 }
 0xa06   :  { %v1324_v24 = vmul.f32 %v1857_v23, %v1853_v10 }
 0xa08   :  { %1775 = vmatmul.mubr.msk.f32.vlgmr.msra.gmra.mrb[18].mxu1 %vm153_vm2, %v1324_v24 }
 0xace   :  { %v1397_v30 = vpop.f32.mrb[12].mxu0 }
 0xacf   :  { %1495 = vrot.lane.b32.xlu0 %v1397_v30, %s1972_s7  ;;  %v1771_v31 = vpop.f32.mrb[13].mxu0 }
 0xadb   :  { %v1473_v32 = vpop.f32.mrb[18].mxu1 }
 0xadc   :  { %1497 = vrot.lane.b32.xlu1 %v1473_v32, %s1972_s7  ;;  %v1776_v33 = vpop.f32.mrb[19].mxu1 }
 0xb41   :  { %v1496_v38 = vpop.permute.xlu0 %1495 }
 0xb42   :  { %v1507_v39 = vsel %vm1506_vm4, %v1504_v37, %v1496_v38 }
 0xb43   :  { %1785 = vmatprep.mubr.msk.f32.mxu0 %vm62_vm0, %v1507_v39 }
 0xb4e   :  { %v1498_v44 = vpop.permute.xlu1 %1497 }
 0xb4f   :  { %v1508_v45 = vsel %vm1506_vm4, %v1505_v43, %v1498_v44 }
 0xb50   :  { %1786 = vmatmul.mubr.msk.f32.vlgmr.msra.gmra.mrb[14].mxu0 %vm62_vm0, %v1508_v45 }
 0xc23   :  { %v1787_v46 = vpop.f32.mrb[14].mxu0 }
 0xc24   :  { %1595 = vst.msk [vmem:[#allocation8 + $0x8] sm:$0xff] %vm62_vm0, %v1787_v46  ;;  %v1585_v52 = vpop.f32.mrb[15].mxu0 }
 0xc25   :  { %1594 = vst.msk [vmem:[#allocation8] sm:$0xff] %vm62_vm0, %v1585_v52 }
 0xc26   :  { %1935 = shalt.err (!%p1932_p0)
}
 0xc27   :  { %s1936_s12 = scalar_lea.hbm %s2212_s3, 256 }
 0xc28   :  { %p1937_p1 = scmp.ne.s32.totalorder %s2212_s3, %s1936_s12  ;;  %p1940_p2 = scmp.lt.u32.totalorder %s1936_s12, %s2212_s3 }
 0xc2a   :  { %p1942_p3 = pnand %p1940_p2, %p1937_p1 }
 0xc2c   :  { %1945 = shalt.err (!%p1942_p3)
}
 0xc2d   :  { %1607 = dma.vmem_to_hbm [thread:$0]  %s1602_s1, 256, %s2212_s3, [#allocation4], %s1954_s24, %s1954_s24, %s1955_s25  }
 0xc2e   :  { %1950 = dma.done.wait [#allocation4], 256  }
 0xc2f   :  { %1951 = vsyncadd [#allocation4], 4294967040 }
 0xc30   :  { %1611 = vsyncpa [#allocation3], 1 }
 0xc31   :  { %1612 = vsyncpa [#allocation6], 1 }
 0xc32   :  { %1613 = vsyncpa [#allocation4], 1 }

</bundles_post_ra>
